<compile_context>
chip_gen: v7x
topology: tpu7x:2x2x1
jax: 0.10.0
libtpu: 0.0.40
codegen_flags: <defaults>
</compile_context>

<pallas_src>
import functools

import jax
import jax.numpy as jnp
import numpy as np
from jax.experimental import pallas as pl
from jax.experimental.pallas import tpu as pltpu


def _round_up(a, m):
    return (a + m - 1) // m * m


def _cdiv(a, b):
    return -(-a // b)


def net_kernel(img_ref, wconv_ref, bconv_ref, wfc_ref, bfc_ref, out_ref):
    # img_ref:   (Bt, 64)   bf16  -- raw 8x8 image, pixel = h*8 + w
    # wconv_ref: (64, 512)  bf16  -- gather-folded conv weight, col = s*128+p*32+c
    # bconv_ref: (1, 128)   f32   -- conv bias tiled over the 4 pooled positions
    # wfc_ref:   (128, 128) bf16  -- fc1 weight, row = p*32 + c, zero-padded cols
    # bfc_ref:   (1, 128)   f32
    # out_ref:   (Bt, 128)  bf16

    # conv1 for all 4 pool-window offsets in a single fused matmul -> (Bt, 512)
    z = jnp.dot(img_ref[...], wconv_ref[...],
                preferred_element_type=jnp.float32)

    # 2x2 stride-2 max-pool == max over the four 128-lane column blocks.
    pooled = jnp.maximum(jnp.maximum(z[:, 0:128], z[:, 128:256]),
                         jnp.maximum(z[:, 256:384], z[:, 384:512]))

    # Bias + ReLU after pooling (bias is per-channel constant across offsets
    # and ReLU is monotone, so this is exactly relu(conv) -> pool).
    pooled = jnp.maximum(pooled + bconv_ref[...], 0.0)

    # fc1 as one 128-deep bf16 matmul, bias, ReLU; lane-dense bf16 store.
    y = jnp.dot(pooled.astype(jnp.bfloat16), wfc_ref[...],
                preferred_element_type=jnp.float32)
    out_ref[...] = jnp.maximum(y + bfc_ref[...], 0.0).astype(out_ref.dtype)


def _fold_gather_into_conv(w_conv):
    """w_conv (32,1,5,5) f32 -> (64, 512) bf16 with col = s*128 + p*32 + c."""
    wconv_mat = w_conv.reshape(32, 25).T                      # (k, c) = (25, 32)
    # Static 0/1 gather: G[s, p, pixel, k] = 1 iff pixel is the k-th element of
    # the 5x5 window at conv-output position (2*ph+dh, 2*pw+dw).
    G = np.zeros((4, 4, 64, 25), np.float32)
    for s in range(4):
        dh, dw = divmod(s, 2)
        for p in range(4):
            ph, pw = divmod(p, 2)
            oh, ow = 2 * ph + dh, 2 * pw + dw
            for k in range(25):
                kh, kw = divmod(k, 5)
                G[s, p, (oh + kh) * 8 + (ow + kw), k] = 1.0
    w_all = jnp.einsum("spxk,kc->spxc", G, wconv_mat)         # (4, 4, 64, 32)
    w_all = w_all.transpose(2, 0, 1, 3).reshape(64, 512)      # col = s*128+p*32+c
    return w_all.astype(jnp.bfloat16)


@functools.partial(jax.jit, static_argnames=("block_b",))
def net_forward(x, w_conv, b_conv, w_fc, b_fc, *, block_b=None):
    """x: (B, 1, 8, 8) f32 NCHW. Returns (B, num_classes) f32."""
    B = x.shape[0]
    K = w_fc.shape[0]
    assert x.shape[1:] == (1, 8, 8), "Net requires 1x8x8 inputs (32*4 flatten)"

    if block_b is None:
        # >=2 tiles when possible (keeps both v7x TensorCores busy); each tile
        # capped around 4096 rows (~1.5 MiB of double-buffered VMEM), which
        # also amortizes per-step overhead on v5e/v6e.
        n_split = max(2, _cdiv(B, 4096))
        block_b = max(8, _round_up(_cdiv(B, n_split), 8))
    n_tiles = _cdiv(B, block_b)
    bpad = n_tiles * block_b
    kpad = 128  # lane-dense output; valid K columns sliced off outside
    assert K <= kpad, "num_classes must be <= 128 for this kernel"

    # ---- parameter re-layout (trace-time glue, tiny) ----
    wconv_all = _fold_gather_into_conv(w_conv)                      # (64, 512) bf16
    bconv_t = jnp.tile(b_conv, 4).reshape(1, 128).astype(jnp.float32)

    # PyTorch NCHW flatten: feature = c*4 + p; kernel layout: row = p*32 + c.
    wfc_r = w_fc.reshape(K, 32, 4).transpose(2, 1, 0).reshape(128, K)
    wfc_pad = jnp.zeros((128, kpad), jnp.float32).at[:, :K].set(wfc_r)
    wfc_pad = wfc_pad.astype(jnp.bfloat16)
    bfc_pad = jnp.zeros((1, kpad), jnp.float32).at[:, :K].set(b_fc)

    # ---- compact image input: (Bpad, 64) bf16 ----
    img = x.reshape(B, 64).astype(jnp.bfloat16)
    if bpad > B:
        img = jnp.concatenate(
            [img, jnp.zeros((bpad - B, 64), jnp.bfloat16)], axis=0)

    out = pl.pallas_call(
        net_kernel,
        out_shape=jax.ShapeDtypeStruct((bpad, kpad), jnp.bfloat16),
        grid=(n_tiles,),
        in_specs=[
            pl.BlockSpec((block_b, 64), lambda i: (i, 0)),     # image
            pl.BlockSpec((64, 512), lambda i: (0, 0)),         # folded conv W
            pl.BlockSpec((1, 128), lambda i: (0, 0)),          # conv bias
            pl.BlockSpec((128, kpad), lambda i: (0, 0)),       # fc W
            pl.BlockSpec((1, kpad), lambda i: (0, 0)),         # fc bias
        ],
        out_specs=pl.BlockSpec((block_b, kpad), lambda i: (i, 0)),
        compiler_params=pltpu.CompilerParams(
            dimension_semantics=("parallel",),
            vmem_limit_bytes=32 * 1024 * 1024),
    )(img, wconv_all, bconv_t, wfc_pad, bfc_pad)

    return out[:B, :K].astype(jnp.float32)


def ref_forward(x, w_conv, b_conv, w_fc, b_fc):
    """Pure-JAX f32 reference matching the PyTorch module semantics."""
    y = jax.lax.conv_general_dilated(
        x, w_conv, window_strides=(1, 1), padding="VALID",
        dimension_numbers=("NCHW", "OIHW", "NCHW"))
    y = y + b_conv[None, :, None, None]
    y = jnp.maximum(y, 0.0)
    y = jax.lax.reduce_window(y, -jnp.inf, jax.lax.max,
                              (1, 1, 2, 2), (1, 1, 2, 2), "VALID")
    y = y.reshape(y.shape[0], -1)
    y = jnp.maximum(y @ w_fc.T + b_fc, 0.0)
    return y


if __name__ == "__main__":
    num_classes = 10
    B = 2
    key = jax.random.PRNGKey(0)
    k1, k2, k3, k4, k5 = jax.random.split(key, 5)

    # Deterministic synthetic parameters (shapes per nn.Module __init__)
    w_conv = jax.random.normal(k1, (32, 1, 5, 5), jnp.float32) * 0.1
    b_conv = jax.random.normal(k2, (32,), jnp.float32) * 0.1
    w_fc = jax.random.normal(k3, (num_classes, 32 * 4), jnp.float32) * 0.1
    b_fc = jax.random.normal(k4, (num_classes,), jnp.float32) * 0.1

    # Input: NCHW, spatial 8x8 so the flatten size equals 32*4 as in the module
    x = jax.random.normal(k5, (B, 1, 8, 8), jnp.float32)

    out = jax.block_until_ready(net_forward(x, w_conv, b_conv, w_fc, b_fc))
    ref = jax.block_until_ready(ref_forward(x, w_conv, b_conv, w_fc, b_fc))

    # bf16 image/weights/output (perf review: workload is HBM-bound) introduce
    # sub-1% drift vs the pure-f32 reference; matmul accumulation stays f32.
    np.testing.assert_allclose(np.asarray(out), np.asarray(ref),
                               rtol=2e-2, atol=2e-2)
    print("KERNEL_OK")
</pallas_src>

<mosaic_0001>
module attributes {stable_mosaic.version = 11 : i64} {
  func.func @net_kernel(%arg0: i32, %arg1: memref<8x64xbf16, #tpu.memory_space<vmem>>, %arg2: memref<64x512xbf16, #tpu.memory_space<vmem>>, %arg3: memref<1x128xf32, #tpu.memory_space<vmem>>, %arg4: memref<128x128xbf16, #tpu.memory_space<vmem>>, %arg5: memref<1x128xf32, #tpu.memory_space<vmem>>, %arg6: memref<8x128xbf16, #tpu.memory_space<vmem>>) attributes {dimension_semantics = [#tpu.dimension_semantics<parallel>], iteration_bounds = array<i64: 1>, scalar_prefetch = 0 : i64, scratch_operands = 0 : i64, tpu.core_type = #tpu.core_type<tc>, window_params = [{transform_indices = @transform_0, window_bounds = array<i64: 8, 64>}, {pipeline_mode = #tpu.pipeline_mode<synchronous>, transform_indices = @transform_1, window_bounds = array<i64: 64, 512>}, {pipeline_mode = #tpu.pipeline_mode<synchronous>, transform_indices = @transform_2, window_bounds = array<i64: 1, 128>}, {pipeline_mode = #tpu.pipeline_mode<synchronous>, transform_indices = @transform_3, window_bounds = array<i64: 128, 128>}, {pipeline_mode = #tpu.pipeline_mode<synchronous>, transform_indices = @transform_4, window_bounds = array<i64: 1, 128>}, {transform_indices = @transform_5, window_bounds = array<i64: 8, 128>}]} {
    %c0 = arith.constant 0 : index
    %c0_0 = arith.constant 0 : index
    %0 = vector.load %arg1[%c0, %c0_0] : memref<8x64xbf16, #tpu.memory_space<vmem>>, vector<8x64xbf16>
    %c0_1 = arith.constant 0 : index
    %c0_2 = arith.constant 0 : index
    %1 = vector.load %arg2[%c0_1, %c0_2] : memref<64x512xbf16, #tpu.memory_space<vmem>>, vector<64x512xbf16>
    %cst = arith.constant dense<0.000000e+00> : vector<8x512xf32>
    %2 = tpu.matmul %0, %1, %cst {dimension_numbers = #tpu.dot_dimension_numbers<[1], [0], [0], [1], [0, 0, 1, 1], [], []>} : vector<8x64xbf16>, vector<64x512xbf16>, vector<8x512xf32> -> vector<8x512xf32>
    %3 = vector.extract_strided_slice %2 {offsets = [0, 0], sizes = [8, 128], strides = [1, 1]} : vector<8x512xf32> to vector<8x128xf32>
    %4 = vector.extract_strided_slice %2 {offsets = [0, 128], sizes = [8, 128], strides = [1, 1]} : vector<8x512xf32> to vector<8x128xf32>
    %5 = arith.maximumf %3, %4 : vector<8x128xf32>
    %6 = vector.extract_strided_slice %2 {offsets = [0, 256], sizes = [8, 128], strides = [1, 1]} : vector<8x512xf32> to vector<8x128xf32>
    %7 = vector.extract_strided_slice %2 {offsets = [0, 384], sizes = [8, 128], strides = [1, 1]} : vector<8x512xf32> to vector<8x128xf32>
    %8 = arith.maximumf %6, %7 : vector<8x128xf32>
    %9 = arith.maximumf %5, %8 : vector<8x128xf32>
    %c0_3 = arith.constant 0 : index
    %c0_4 = arith.constant 0 : index
    %10 = vector.load %arg3[%c0_3, %c0_4] : memref<1x128xf32, #tpu.memory_space<vmem>>, vector<1x128xf32>
    %11 = vector.broadcast %10 : vector<1x128xf32> to vector<8x128xf32>
    %12 = arith.addf %9, %11 : vector<8x128xf32>
    %cst_5 = arith.constant 0.000000e+00 : f32
    %13 = vector.broadcast %cst_5 : f32 to vector<8x128xf32>
    %14 = arith.maximumf %12, %13 : vector<8x128xf32>
    %15 = arith.truncf %14 : vector<8x128xf32> to vector<8x128xbf16>
    %c0_6 = arith.constant 0 : index
    %c0_7 = arith.constant 0 : index
    %16 = vector.load %arg4[%c0_6, %c0_7] : memref<128x128xbf16, #tpu.memory_space<vmem>>, vector<128x128xbf16>
    %cst_8 = arith.constant dense<0.000000e+00> : vector<8x128xf32>
    %17 = tpu.matmul %15, %16, %cst_8 {dimension_numbers = #tpu.dot_dimension_numbers<[1], [0], [0], [1], [0, 0, 1, 1], [], []>} : vector<8x128xbf16>, vector<128x128xbf16>, vector<8x128xf32> -> vector<8x128xf32>
    %c0_9 = arith.constant 0 : index
    %c0_10 = arith.constant 0 : index
    %18 = vector.load %arg5[%c0_9, %c0_10] : memref<1x128xf32, #tpu.memory_space<vmem>>, vector<1x128xf32>
    %19 = vector.broadcast %18 : vector<1x128xf32> to vector<8x128xf32>
    %20 = arith.addf %17, %19 : vector<8x128xf32>
    %cst_11 = arith.constant 0.000000e+00 : f32
    %21 = vector.broadcast %cst_11 : f32 to vector<8x128xf32>
    %22 = arith.maximumf %20, %21 : vector<8x128xf32>
    %23 = arith.truncf %22 : vector<8x128xf32> to vector<8x128xbf16>
    %c0_12 = arith.constant 0 : index
    %c0_13 = arith.constant 0 : index
    %24 = vector.load %arg6[%c0_12, %c0_13] : memref<8x128xbf16, #tpu.memory_space<vmem>>, vector<8x128xbf16>
    tpu.vector_store %arg6[%c0_12, %c0_13], %23 {strides = array<i32>} : memref<8x128xbf16, #tpu.memory_space<vmem>>, vector<8x128xbf16>,
    return
  }
  func.func @transform_0(%arg0: i32) -> (i32, i32) {
    %c0_i32 = arith.constant 0 : i32
    %c0_i32_0 = arith.constant 0 : i32
    return %arg0, %c0_i32 : i32, i32
  }
  func.func @transform_1(%arg0: i32) -> (i32, i32) {
    %c0_i32 = arith.constant 0 : i32
    %c0_i32_0 = arith.constant 0 : i32
    %c0_i32_1 = arith.constant 0 : i32
    return %c0_i32, %c0_i32_0 : i32, i32
  }
  func.func @transform_2(%arg0: i32) -> (i32, i32) {
    %c0_i32 = arith.constant 0 : i32
    %c0_i32_0 = arith.constant 0 : i32
    %c0_i32_1 = arith.constant 0 : i32
    return %c0_i32, %c0_i32_0 : i32, i32
  }
  func.func @transform_3(%arg0: i32) -> (i32, i32) {
    %c0_i32 = arith.constant 0 : i32
    %c0_i32_0 = arith.constant 0 : i32
    %c0_i32_1 = arith.constant 0 : i32
    return %c0_i32, %c0_i32_0 : i32, i32
  }
  func.func @transform_4(%arg0: i32) -> (i32, i32) {
    %c0_i32 = arith.constant 0 : i32
    %c0_i32_0 = arith.constant 0 : i32
    %c0_i32_1 = arith.constant 0 : i32
    return %c0_i32, %c0_i32_0 : i32, i32
  }
  func.func @transform_5(%arg0: i32) -> (i32, i32) {
    %c0_i32 = arith.constant 0 : i32
    %c0_i32_0 = arith.constant 0 : i32
    return %arg0, %c0_i32 : i32, i32
  }
}

</mosaic_0001>

<bundles_post_ra>
// kernel: tile.8
= control target key start
LH: loop header
LB: loop body
LE: loop exit
PB: predicated region body
PF: predicated region fallthrough
CT: control target
= control target key end

     0   :  { %s22_s0 = inlined_call_operand.vmem [shape: f32[32], index: 0, kind: input, shape index: {}]   ;;  %s23_s1 = inlined_call_operand.vmem [shape: f32[4,32], index: 1, kind: output, shape index: {}]  }
   0x1   :  { %v4_v0 = vld [vmem:[%s22_s0] ss:$0 sm:$0xff] }
   0x2   :  { %5 = vst [vmem:[%s23_s1] sm:$0xf] %v4_v0 }

// kernel: tile.9
= control target key start
LH: loop header
LB: loop body
LE: loop exit
PB: predicated region body
PF: predicated region fallthrough
CT: control target
= control target key end

     0   :  { %vm7_vm0 = vcmask 261120   ;;  %s37_s8 = smov 32   ;;  %s38_s9 = smov 64   ;;  %vm13_vm1 = vcmask 1048320   ;;  %vm19_vm2 = vcmask 785920   ;;  %vm25_vm3 = vcmask 523520   ;;  %s55_s0 = inlined_call_operand.vmem [shape: f32[4,32], index: 0, kind: input, shape index: {}]   ;;  %s56_s1 = inlined_call_operand.vmem [shape: f32[1,128], index: 1, kind: output, shape index: {}]  }
   0x1   :  { %v4_v0 = vld [vmem:[%s55_s0] sm:$0xf]  ;;  %s36_s0 = smov 96  }
   0x2   :  { %5 = vst [vmem:[#allocation1] sm:$0xf] %v4_v0 }
   0x9   :  { %v10_v1 = vld [vmem:[#allocation1 + $0x3] sm:$0x1]   ;;  %v22_v2 = vld [vmem:[#allocation1 + $0x1] sm:$0x1]   ;;  %v6_v3 = vld [vmem:[#allocation1] sm:$0x1]  }
   0xa   :  { %11 = vrot.lane.b32.xlu0 %v10_v1, %s36_s0  ;;  %23 = vrot.lane.b32.xlu1 %v22_v2, %s37_s8  ;;  %v16_v4 = vld [vmem:[#allocation1 + $0x2] sm:$0x1]   ;;  %8 = vst.msk [vmem:[#allocation0] sm:$0x1] %vm7_vm0, %v6_v3  }
   0xe   :  { %17 = vrot.lane.b32.xlu0 %v16_v4, %s38_s9 }
  0x7c   :  { %v12_v5 = vpop.permute.xlu0 %11   ;;  %v24_v6 = vpop.permute.xlu1 %23  }
  0x7d   :  { %14 = vst.msk [vmem:[#allocation0] sm:$0x1] %vm13_vm1, %v12_v5  }
  0x80   :  { %v18_v7 = vpop.permute.xlu0 %17  }
  0x81   :  { %20 = vst.msk [vmem:[#allocation0] sm:$0x1] %vm19_vm2, %v18_v7  }
  0x82   :  { %26 = vst.msk [vmem:[#allocation0] sm:$0x1] %vm25_vm3, %v24_v6  }
  0x89   :  { %v30_v8 = vld [vmem:[#allocation0] sm:$0x1] }
  0x8a   :  { %32 = vst [vmem:[%s56_s1] sm:$0x1] %v30_v8 }

// kernel: net_forward.1
= control target key start
LH: loop header
LB: loop body
LE: loop exit
PB: predicated region body
PF: predicated region fallthrough
CT: control target
= control target key end

     0   :  { %v427_v1 = vmov 0   ;;  %v428_v2 = vmov 0.0   ;;  %vm118_vm0 = vcmask 523264   ;;  %vm429_vm1 = vmmov 0   ;;  %s555_s1 = inlined_call_operand.vmem [shape: bf16[64,512], index: 1, kind: input, shape index: {}]   ;;  %s556_s3 = inlined_call_operand.vmem [shape: bf16[128,128], index: 3, kind: input, shape index: {}]   ;;  %s557_s0 = inlined_call_operand.vmem [shape: bf16[8,64], index: 0, kind: input, shape index: {}]   ;;  %s558_s2 = inlined_call_operand.vmem [shape: f32[1,128], index: 2, kind: input, shape index: {}]   ;;  %s559_s4 = inlined_call_operand.vmem [shape: f32[1,128], index: 4, kind: input, shape index: {}]   ;;  %s560_s5 = inlined_call_operand.vmem [shape: bf16[8,128], index: 5, kind: output, shape index: {}]  }
   0x1   :  { %v395_v0 = vld [vmem:[%s555_s1 + $0x4] ss:$16 sps:$4 sm:$0xff]   ;;  %154 = vmatprep.mubr.bf16.mxu1 %v427_v1  ;;  %372 = vmatprep.subr.bf16.mxu0 %v428_v2  ;;  %v397_v3 = vld [vmem:[%s555_s1] ss:$16 sps:$4 sm:$0xff]   ;;  %v409_v10 = vld [vmem:[%s555_s1 + $0xc] ss:$16 sps:$4 sm:$0xff]  }
   0x2   :  { %122 = vmatprep.subr.bf16.mxu1 %v395_v0  ;;  %v398_v4 = vld [vmem:[%s555_s1 + $0x24] ss:$16 sps:$4 sm:$0xff]   ;;  %v400_v5 = vld [vmem:[%s555_s1 + $0x20] ss:$16 sps:$4 sm:$0xff]   ;;  %v407_v13 = vld [vmem:[%s555_s1 + $0x8] ss:$16 sps:$4 sm:$0xff]   ;;  %388 = vmatprep.mubr.msk.bf16.mxu0 %vm429_vm1, %v428_v2 }
   0x3   :  { %123 = vmatpush1.bf16.msra.mxu1 %v397_v3  ;;  %v401_v6 = vld [vmem:[%s555_s1 + $0x44] ss:$16 sps:$4 sm:$0xff]   ;;  %v403_v7 = vld [vmem:[%s555_s1 + $0x40] ss:$16 sps:$4 sm:$0xff]   ;;  %v412_v14 = vld [vmem:[%s555_s1 + $0x2c] ss:$16 sps:$4 sm:$0xff]  }
   0x4   :  { %124 = vmatprep.subr.bf16.mxu1 %v398_v4  ;;  %v404_v8 = vld [vmem:[%s555_s1 + $0x64] ss:$16 sps:$4 sm:$0xff]   ;;  %v406_v9 = vld [vmem:[%s555_s1 + $0x60] ss:$16 sps:$4 sm:$0xff]   ;;  %v410_v15 = vld [vmem:[%s555_s1 + $0x28] ss:$16 sps:$4 sm:$0xff]  }
   0x5   :  { %v419_v11 = vld [vmem:[%s556_s3] sm:$0xff]   ;;  %v415_v16 = vld [vmem:[%s555_s1 + $0x4c] ss:$16 sps:$4 sm:$0xff]   ;;  %v413_v17 = vld [vmem:[%s555_s1 + $0x48] ss:$16 sps:$4 sm:$0xff]  }
   0x6   :  { %v21_v12 = vld [vmem:[%s557_s0] sm:$0xf]  ;;  %373 = vmatpush3.bf16.msra.mxu0 %v419_v11  ;;  %v418_v18 = vld [vmem:[%s555_s1 + $0x6c] ss:$16 sps:$4 sm:$0xff]   ;;  %v416_v19 = vld [vmem:[%s555_s1 + $0x68] ss:$16 sps:$4 sm:$0xff]  }
   0x7   :  { %125 = vmatpush1.bf16.msra.mxu1 %v400_v5  ;;  %374 = vmatprep.subr.bf16.mxu0 %v428_v2  ;;  %v420_v20 = vld [vmem:[%s556_s3 + $0x8] sm:$0xff]   ;;  %v421_v21 = vld [vmem:[%s556_s3 + $0x10] sm:$0xff]   ;;  %v422_v22 = vld [vmem:[%s556_s3 + $0x18] sm:$0xff]  }
   0x8   :  { %126 = vmatprep.subr.bf16.mxu1 %v401_v6  ;;  %v423_v23 = vld [vmem:[%s556_s3 + $0x20] sm:$0xff]   ;;  %v424_v24 = vld [vmem:[%s556_s3 + $0x28] sm:$0xff]   ;;  %v425_v25 = vld [vmem:[%s556_s3 + $0x30] sm:$0xff]  }
   0x9   :  { %v426_v26 = vld [vmem:[%s556_s3 + $0x38] sm:$0xff]   ;;  %v353_v36 = vld [vmem:[%s558_s2] ss:$0 sm:$0xff] }
   0xa   :  { %375 = vmatpush3.bf16.msra.mxu0 %v420_v20  ;;  %v354_v42 = vld [vmem:[%s559_s4] ss:$0 sm:$0xff] }
   0xb   :  { %127 = vmatpush1.bf16.msra.mxu1 %v403_v7  ;;  %376 = vmatprep.subr.bf16.mxu0 %v428_v2 }
   0xc   :  { %128 = vmatprep.subr.bf16.mxu1 %v404_v8 }
   0xe   :  { %377 = vmatpush3.bf16.msra.mxu0 %v421_v21 }
   0xf   :  { %129 = vmatpush1.bf16.msra.mxu1 %v406_v9  ;;  %378 = vmatprep.subr.bf16.mxu0 %v428_v2 }
  0x10   :  { %163 = vmatprep.subr.bf16.mxu1 %v409_v10 }
  0x12   :  { %351 = vmatmul.mubr.msk.bf16.vlgmr.msra.gmra.mrb[0].mxu1 %vm118_vm0, %v21_v12  ;;  %379 = vmatpush3.bf16.msra.mxu0 %v422_v22 }
  0x13   :  { %164 = vmatpush1.bf16.msra.mxu1 %v407_v13  ;;  %195 = vmatprep.mubr.bf16.mxu1 %v427_v1 }
  0x14   :  { %165 = vmatprep.subr.bf16.mxu1 %v412_v14  ;;  %380 = vmatprep.subr.bf16.mxu0 %v428_v2 }
  0x16   :  { %381 = vmatpush3.bf16.msra.mxu0 %v423_v23 }
  0x17   :  { %166 = vmatpush1.bf16.msra.mxu1 %v410_v15  ;;  %382 = vmatprep.subr.bf16.mxu0 %v428_v2 }
  0x18   :  { %167 = vmatprep.subr.bf16.mxu1 %v415_v16 }
  0x1a   :  { %383 = vmatpush3.bf16.msra.mxu0 %v424_v24 }
  0x1b   :  { %168 = vmatpush1.bf16.msra.mxu1 %v413_v17  ;;  %384 = vmatprep.subr.bf16.mxu0 %v428_v2 }
  0x1c   :  { %169 = vmatprep.subr.bf16.mxu1 %v418_v18 }
  0x1e   :  { %385 = vmatpush3.bf16.msra.mxu0 %v425_v25 }
  0x1f   :  { %170 = vmatpush1.bf16.msra.mxu1 %v416_v19  ;;  %386 = vmatprep.subr.bf16.mxu0 %v428_v2 }
  0x22   :  { %352 = vmatmul.mubr.msk.bf16.vlgmr.msra.gmra.mrb[4].mxu1 %vm118_vm0, %v21_v12  ;;  %387 = vmatpush3.bf16.msra.mxu0 %v426_v26 }
  0xe5   :  { %v156_v27 = vpop.f32.mrb[0].mxu1 }
  0xe6   :  { %v158_v28 = vpop.f32.mrb[1].mxu1 }
  0xe7   :  { %v204_v29 = vmax.f32 %v156_v27, %v158_v28  ;;  %v160_v30 = vpop.f32.mrb[2].mxu1 }
  0xe8   :  { %v161_v31 = vpop.f32.mrb[3].mxu1 }
  0xf5   :  { %v197_v32 = vpop.f32.mrb[4].mxu1 }
  0xf6   :  { %v199_v33 = vpop.f32.mrb[5].mxu1 }
  0xf7   :  { %v205_v34 = vmax.f32 %v197_v32, %v199_v33  ;;  %v201_v35 = vpop.f32.mrb[6].mxu1 }
  0xf8   :  { %v202_v37 = vpop.f32.mrb[7].mxu1 }
  0xf9   :  { %v206_v38 = vmax.f32 %v204_v29, %v205_v34 }
  0xfb   :  { %v214_v39 = vadd.f32 %v353_v36, %v206_v38 }
  0xfd   :  { %v215_v40 = vmax.f32 %v214_v39, 0.0 }
  0xff   :  { %v216_v41 = vpack.c.bf16 %v215_v40, %v215_v40 }
 0x101   :  { %389 = vmatmul.mubr.bf16.vlgmr.msra.gmra.mrb[0].mxu0 %v216_v41 }
 0x1d4   :  { %v322_v43 = vpop.f32.mrb[0].mxu0 }
 0x1d5   :  { %v323_v44 = vadd.f32 %v354_v42, %v322_v43  ;;  %v390_v45 = vpop.f32.mrb[1].mxu0 }
 0x1d6   :  { %v325_v46 = vpop.f32.mrb[2].mxu0 }
 0x1d7   :  { %v328_v47 = vmax.f32 %v323_v44, 0.0  ;;  %v391_v48 = vpop.f32.mrb[3].mxu0 }
 0x1d9   :  { %v329_v49 = vpack.c.bf16 %v328_v47, %v328_v47 }
 0x1db   :  { %330 = vst [vmem:[%s560_s5] sm:$0xf] %v329_v49 }

</bundles_post_ra>
